<compile_context>
chip_gen: v7x
topology: tpu7x:2x2x1
jax: 0.10.0
libtpu: 0.0.40
codegen_flags: <defaults>
</compile_context>

<pallas_src>
import functools

import jax
import jax.numpy as jnp
from jax.experimental import pallas as pl
from jax.experimental.pallas import tpu as pltpu

LANES = 128
C_IN = 4                    # (x, y, z, feat0) per point
PACK = LANES // C_IN        # 32 points packed per 128-lane row
GROUP = 8 * PACK            # 256 points per (8, 128) vreg-shaped group


# ---------------------------------------------------------------------------
# Single fused kernel: streaming point sum + (projection, mean, MLP, heads)
# epilogue on the last grid step.
# ---------------------------------------------------------------------------
def _fused_kernel(pts_ref,
                  wp_ref, be_ref,
                  w1_ref, b1_ref, w2_ref, b2_ref, w3_ref, b3_ref,
                  wh_ref, bh_ref,
                  out_ref, acc_ref, *, inv_n):
    i = pl.program_id(0)

    @pl.when(i == 0)
    def _():
        acc_ref[...] = jnp.zeros_like(acc_ref)

    # Streaming point sum: (tile_groups, 8, 128) -> (8, 128) partials.
    # Pure VPU adds; the single cross-sublane reduce happens once, below.
    acc_ref[...] += jnp.sum(pts_ref[...], axis=0)

    @pl.when(i == pl.num_programs(0) - 1)
    def _():
        colsum = jnp.sum(acc_ref[...], axis=0, keepdims=True)        # (1, 128)

        # mean(X @ W_enc + b_enc) == (sum(X) @ W_enc) / N + b_enc.
        # wp_ref holds W_enc tiled to the packed 128-lane layout, so the
        # packed column sums project with one (1,128)@(128,128) matmul.
        feats_mean = (jnp.dot(colsum, wp_ref[...],
                              preferred_element_type=jnp.float32) * inv_n
                      + be_ref[...])                                  # (1, 128)

        # feature_layer: 128 -> 64 -> ReLU -> 32 -> ReLU -> 8
        h1 = jnp.maximum(
            jnp.dot(feats_mean, w1_ref[...],
                    preferred_element_type=jnp.float32) + b1_ref[...], 0.0)
        h2 = jnp.maximum(
            jnp.dot(h1, w2_ref[...],
                    preferred_element_type=jnp.float32) + b2_ref[...], 0.0)
        emb = (jnp.dot(h2, w3_ref[...],
                       preferred_element_type=jnp.float32) + b3_ref[...])

        # clf / reg / cyc heads fused into one (8, 16) weight:
        #   lanes [0:8] = logits, [8:14] = reg, [14:15] = cyc, [15] = pad.
        out_ref[...] = (jnp.dot(emb, wh_ref[...],
                                preferred_element_type=jnp.float32)
                        + bh_ref[...])


def ptv3_deteccion_forward(ventana, enc_params, head_params, *,
                           max_tile_groups=128):
    """ventana: list of [Ni, 4] float32 point arrays (3 coords ++ 1 feat)."""
    all_points = jnp.concatenate(ventana, axis=0).astype(jnp.float32)  # (N, 4)
    n_true = all_points.shape[0]

    w_enc, b_enc = enc_params
    (w1, b1, w2, b2, w3, b3, wc, bc, wr, br, wy, by) = head_params

    # ---- lane-dense packing of the point stream (free wrapper reshape) ----
    n_groups_min = pl.cdiv(n_true, GROUP)
    tile_groups = min(max_tile_groups, n_groups_min)
    n_groups = pl.cdiv(n_groups_min, tile_groups) * tile_groups
    n_pad = n_groups * GROUP
    pts = jnp.pad(all_points, ((0, n_pad - n_true), (0, 0)))  # zeros: sum-safe
    packed = pts.reshape(n_groups, 8, LANES)                  # 256 pts / group

    # ---- one-time weight prep ---------------------------------------------
    # W_enc tiled so packed lane 4*k + c multiplies row c of W_enc.
    w_packed = jnp.tile(w_enc, (PACK, 1))                             # (128, 128)
    w_heads = jnp.pad(jnp.concatenate([wc, wr, wy], axis=1),
                      ((0, 0), (0, 1)))                               # (8, 16)
    b_heads = jnp.pad(jnp.concatenate([bc, br, by], axis=1),
                      ((0, 0), (0, 1)))                               # (1, 16)

    weights = (w_packed, b_enc, w1, b1, w2, b2, w3, b3, w_heads, b_heads)
    resident_specs = [pl.BlockSpec(w.shape, lambda i: (0, 0)) for w in weights]

    kernel = functools.partial(_fused_kernel, inv_n=1.0 / float(n_true))
    out = pl.pallas_call(
        kernel,
        out_shape=jax.ShapeDtypeStruct((1, 16), jnp.float32),
        grid_spec=pltpu.PrefetchScalarGridSpec(
            num_scalar_prefetch=0,
            grid=(n_groups // tile_groups,),
            in_specs=([pl.BlockSpec((tile_groups, 8, LANES),
                                    lambda i: (i, 0, 0))]
                      + resident_specs),
            out_specs=pl.BlockSpec((1, 16), lambda i: (0, 0)),
            scratch_shapes=[pltpu.VMEM((8, LANES), jnp.float32)],
        ),
        compiler_params=pltpu.CompilerParams(
            dimension_semantics=("arbitrary",)),
    )(packed, *weights)

    logits = out[:, 0:8]
    reg_out = out[:, 8:14]
    cyc_out = out[:, 14:15]
    return logits, reg_out, cyc_out


# ---------------------------------------------------------------------------
# Parameter construction (deterministic, in-script).
# ---------------------------------------------------------------------------
def make_params(key):
    def lin(k, fan_in, fan_out):
        kw, kb = jax.random.split(k)
        bound = 1.0 / jnp.sqrt(float(fan_in))
        w = jax.random.uniform(kw, (fan_in, fan_out), jnp.float32,
                               -bound, bound)
        b = jax.random.uniform(kb, (1, fan_out), jnp.float32, -bound, bound)
        return w, b

    keys = jax.random.split(key, 7)
    w_enc, b_enc = lin(keys[0], 4, 128)      # PTv3 stand-in projection
    w1, b1 = lin(keys[1], 128, 64)           # feature_layer[0]
    w2, b2 = lin(keys[2], 64, 32)            # feature_layer[2]
    w3, b3 = lin(keys[3], 32, 8)             # feature_layer[4]
    wc, bc = lin(keys[4], 8, 8)              # clf_head
    wr, br = lin(keys[5], 8, 6)              # reg_head
    wy, by = lin(keys[6], 8, 1)              # cyc_head
    return (w_enc, b_enc), (w1, b1, w2, b2, w3, b3, wc, bc, wr, br, wy, by)


# Pure-JAX reference of the same (stand-in) forward, for validation.
def _reference_forward(ventana, enc_params, head_params):
    all_points = jnp.concatenate(ventana, axis=0)
    w_enc, b_enc = enc_params
    (w1, b1, w2, b2, w3, b3, wc, bc, wr, br, wy, by) = head_params
    feats = all_points @ w_enc + b_enc
    fm = jnp.mean(feats, axis=0, keepdims=True)
    h1 = jax.nn.relu(fm @ w1 + b1)
    h2 = jax.nn.relu(h1 @ w2 + b2)
    emb = h2 @ w3 + b3
    return emb @ wc + bc, emb @ wr + br, emb @ wy + by


if __name__ == "__main__":
    key = jax.random.PRNGKey(0)
    kp, kd = jax.random.split(key)
    enc_params, head_params = make_params(kp)

    # three ragged point clouds, total N = 256
    sizes = (96, 80, 80)
    dkeys = jax.random.split(kd, len(sizes))
    ventana = [jax.random.normal(k, (n, 4), jnp.float32)
               for k, n in zip(dkeys, sizes)]

    logits, reg_out, cyc_out = ptv3_deteccion_forward(
        ventana, enc_params, head_params)
    jax.block_until_ready((logits, reg_out, cyc_out))

    assert logits.shape == (1, 8)
    assert reg_out.shape == (1, 6)
    assert cyc_out.shape == (1, 1)

    ref_logits, ref_reg, ref_cyc = _reference_forward(
        ventana, enc_params, head_params)
    assert jnp.allclose(logits, ref_logits, rtol=2e-3, atol=2e-3)
    assert jnp.allclose(reg_out, ref_reg, rtol=2e-3, atol=2e-3)
    assert jnp.allclose(cyc_out, ref_cyc, rtol=2e-3, atol=2e-3)

    print("KERNEL_OK")
</pallas_src>

<mosaic_0001>
module attributes {stable_mosaic.version = 11 : i64} {
  func.func @_fused_kernel(%arg0: i32, %arg1: memref<1x8x128xf32, #tpu.memory_space<vmem>>, %arg2: memref<128x128xf32, #tpu.memory_space<vmem>>, %arg3: memref<1x128xf32, #tpu.memory_space<vmem>>, %arg4: memref<128x64xf32, #tpu.memory_space<vmem>>, %arg5: memref<1x64xf32, #tpu.memory_space<vmem>>, %arg6: memref<64x32xf32, #tpu.memory_space<vmem>>, %arg7: memref<1x32xf32, #tpu.memory_space<vmem>>, %arg8: memref<32x8xf32, #tpu.memory_space<vmem>>, %arg9: memref<1x8xf32, #tpu.memory_space<vmem>>, %arg10: memref<8x16xf32, #tpu.memory_space<vmem>>, %arg11: memref<1x16xf32, #tpu.memory_space<vmem>>, %arg12: memref<1x16xf32, #tpu.memory_space<vmem>>, %arg13: memref<8x128xf32, #tpu.memory_space<vmem>>) attributes {dimension_semantics = [#tpu.dimension_semantics<arbitrary>], iteration_bounds = array<i64: 1>, scalar_prefetch = 0 : i64, scratch_operands = 1 : i64, tpu.core_type = #tpu.core_type<tc>, window_params = [{transform_indices = @transform_0, window_bounds = array<i64: 1, 8, 128>}, {pipeline_mode = #tpu.pipeline_mode<synchronous>, transform_indices = @transform_1, window_bounds = array<i64: 128, 128>}, {pipeline_mode = #tpu.pipeline_mode<synchronous>, transform_indices = @transform_2, window_bounds = array<i64: 1, 128>}, {pipeline_mode = #tpu.pipeline_mode<synchronous>, transform_indices = @transform_3, window_bounds = array<i64: 128, 64>}, {pipeline_mode = #tpu.pipeline_mode<synchronous>, transform_indices = @transform_4, window_bounds = array<i64: 1, 64>}, {pipeline_mode = #tpu.pipeline_mode<synchronous>, transform_indices = @transform_5, window_bounds = array<i64: 64, 32>}, {pipeline_mode = #tpu.pipeline_mode<synchronous>, transform_indices = @transform_6, window_bounds = array<i64: 1, 32>}, {pipeline_mode = #tpu.pipeline_mode<synchronous>, transform_indices = @transform_7, window_bounds = array<i64: 32, 8>}, {pipeline_mode = #tpu.pipeline_mode<synchronous>, transform_indices = @transform_8, window_bounds = array<i64: 1, 8>}, {pipeline_mode = #tpu.pipeline_mode<synchronous>, transform_indices = @transform_9, window_bounds = array<i64: 8, 16>}, {pipeline_mode = #tpu.pipeline_mode<synchronous>, transform_indices = @transform_10, window_bounds = array<i64: 1, 16>}, {pipeline_mode = #tpu.pipeline_mode<synchronous>, transform_indices = @transform_11, window_bounds = array<i64: 1, 16>}]} {
    %c0_i32 = arith.constant 0 : i32
    %0 = arith.cmpi eq, %arg0, %c0_i32 : i32
    %1 = arith.extui %0 : i1 to i32
    %c0_i32_0 = arith.constant 0 : i32
    %2 = arith.cmpi ne, %1, %c0_i32_0 : i32
    scf.if %2 {
      %cst_9 = arith.constant 0.000000e+00 : f32
      %11 = vector.broadcast %cst_9 : f32 to vector<8x128xf32>
      %c0_10 = arith.constant 0 : index
      %c0_11 = arith.constant 0 : index
      %12 = vector.load %arg13[%c0_10, %c0_11] : memref<8x128xf32, #tpu.memory_space<vmem>>, vector<8x128xf32>
      tpu.vector_store %arg13[%c0_10, %c0_11], %11 {strides = array<i32>} : memref<8x128xf32, #tpu.memory_space<vmem>>, vector<8x128xf32>,
    } else {
    }
    %c0 = arith.constant 0 : index
    %c0_1 = arith.constant 0 : index
    %3 = vector.load %arg13[%c0, %c0_1] : memref<8x128xf32, #tpu.memory_space<vmem>>, vector<8x128xf32>
    %c0_2 = arith.constant 0 : index
    %c0_3 = arith.constant 0 : index
    %c0_4 = arith.constant 0 : index
    %4 = vector.load %arg1[%c0_2, %c0_3, %c0_4] : memref<1x8x128xf32, #tpu.memory_space<vmem>>, vector<1x8x128xf32>
    %cst = arith.constant dense<0.000000e+00> : vector<8x128xf32>
    %5 = vector.multi_reduction <add>, %4, %cst [0] : vector<1x8x128xf32> to vector<8x128xf32>
    %6 = arith.addf %3, %5 : vector<8x128xf32>
    %c0_5 = arith.constant 0 : index
    %c0_6 = arith.constant 0 : index
    %7 = vector.load %arg13[%c0_5, %c0_6] : memref<8x128xf32, #tpu.memory_space<vmem>>, vector<8x128xf32>
    tpu.vector_store %arg13[%c0_5, %c0_6], %6 {strides = array<i32>} : memref<8x128xf32, #tpu.memory_space<vmem>>, vector<8x128xf32>,
    %c0_i32_7 = arith.constant 0 : i32
    %8 = arith.cmpi eq, %arg0, %c0_i32_7 : i32
    %9 = arith.extui %8 : i1 to i32
    %c0_i32_8 = arith.constant 0 : i32
    %10 = arith.cmpi ne, %9, %c0_i32_8 : i32
    scf.if %10 {
      %c0_9 = arith.constant 0 : index
      %c0_10 = arith.constant 0 : index
      %11 = vector.load %arg13[%c0_9, %c0_10] : memref<8x128xf32, #tpu.memory_space<vmem>>, vector<8x128xf32>
      %cst_11 = arith.constant dense<0.000000e+00> : vector<128xf32>
      %12 = vector.multi_reduction <add>, %11, %cst_11 [0] : vector<8x128xf32> to vector<128xf32>
      %13 = vector.shape_cast %12 : vector<128xf32> to vector<1x128xf32>
      %c0_12 = arith.constant 0 : index
      %c0_13 = arith.constant 0 : index
      %14 = vector.load %arg2[%c0_12, %c0_13] : memref<128x128xf32, #tpu.memory_space<vmem>>, vector<128x128xf32>
      %cst_14 = arith.constant dense<0.000000e+00> : vector<1x128xf32>
      %15 = tpu.matmul %13, %14, %cst_14 {dimension_numbers = #tpu.dot_dimension_numbers<[1], [0], [0], [1], [0, 0, 1, 1], [], []>} : vector<1x128xf32>, vector<128x128xf32>, vector<1x128xf32> -> vector<1x128xf32>
      %cst_15 = arith.constant 3.906250e-03 : f32
      %16 = vector.broadcast %cst_15 : f32 to vector<1x128xf32>
      %17 = arith.mulf %15, %16 : vector<1x128xf32>
      %c0_16 = arith.constant 0 : index
      %c0_17 = arith.constant 0 : index
      %18 = vector.load %arg3[%c0_16, %c0_17] : memref<1x128xf32, #tpu.memory_space<vmem>>, vector<1x128xf32>
      %19 = arith.addf %17, %18 : vector<1x128xf32>
      %c0_18 = arith.constant 0 : index
      %c0_19 = arith.constant 0 : index
      %20 = vector.load %arg4[%c0_18, %c0_19] : memref<128x64xf32, #tpu.memory_space<vmem>>, vector<128x64xf32>
      %cst_20 = arith.constant dense<0.000000e+00> : vector<1x64xf32>
      %21 = tpu.matmul %19, %20, %cst_20 {dimension_numbers = #tpu.dot_dimension_numbers<[1], [0], [0], [1], [0, 0, 1, 1], [], []>} : vector<1x128xf32>, vector<128x64xf32>, vector<1x64xf32> -> vector<1x64xf32>
      %c0_21 = arith.constant 0 : index
      %c0_22 = arith.constant 0 : index
      %22 = vector.load %arg5[%c0_21, %c0_22] : memref<1x64xf32, #tpu.memory_space<vmem>>, vector<1x64xf32>
      %23 = arith.addf %21, %22 : vector<1x64xf32>
      %cst_23 = arith.constant 0.000000e+00 : f32
      %24 = vector.broadcast %cst_23 : f32 to vector<1x64xf32>
      %25 = arith.maximumf %23, %24 : vector<1x64xf32>
      %c0_24 = arith.constant 0 : index
      %c0_25 = arith.constant 0 : index
      %26 = vector.load %arg6[%c0_24, %c0_25] : memref<64x32xf32, #tpu.memory_space<vmem>>, vector<64x32xf32>
      %cst_26 = arith.constant dense<0.000000e+00> : vector<1x32xf32>
      %27 = tpu.matmul %25, %26, %cst_26 {dimension_numbers = #tpu.dot_dimension_numbers<[1], [0], [0], [1], [0, 0, 1, 1], [], []>} : vector<1x64xf32>, vector<64x32xf32>, vector<1x32xf32> -> vector<1x32xf32>
      %c0_27 = arith.constant 0 : index
      %c0_28 = arith.constant 0 : index
      %28 = vector.load %arg7[%c0_27, %c0_28] : memref<1x32xf32, #tpu.memory_space<vmem>>, vector<1x32xf32>
      %29 = arith.addf %27, %28 : vector<1x32xf32>
      %cst_29 = arith.constant 0.000000e+00 : f32
      %30 = vector.broadcast %cst_29 : f32 to vector<1x32xf32>
      %31 = arith.maximumf %29, %30 : vector<1x32xf32>
      %c0_30 = arith.constant 0 : index
      %c0_31 = arith.constant 0 : index
      %32 = vector.load %arg8[%c0_30, %c0_31] : memref<32x8xf32, #tpu.memory_space<vmem>>, vector<32x8xf32>
      %cst_32 = arith.constant dense<0.000000e+00> : vector<1x8xf32>
      %33 = tpu.matmul %31, %32, %cst_32 {dimension_numbers = #tpu.dot_dimension_numbers<[1], [0], [0], [1], [0, 0, 1, 1], [], []>} : vector<1x32xf32>, vector<32x8xf32>, vector<1x8xf32> -> vector<1x8xf32>
      %c0_33 = arith.constant 0 : index
      %c0_34 = arith.constant 0 : index
      %34 = vector.load %arg9[%c0_33, %c0_34] : memref<1x8xf32, #tpu.memory_space<vmem>>, vector<1x8xf32>
      %35 = arith.addf %33, %34 : vector<1x8xf32>
      %c0_35 = arith.constant 0 : index
      %c0_36 = arith.constant 0 : index
      %36 = vector.load %arg10[%c0_35, %c0_36] : memref<8x16xf32, #tpu.memory_space<vmem>>, vector<8x16xf32>
      %cst_37 = arith.constant dense<0.000000e+00> : vector<1x16xf32>
      %37 = tpu.matmul %35, %36, %cst_37 {dimension_numbers = #tpu.dot_dimension_numbers<[1], [0], [0], [1], [0, 0, 1, 1], [], []>} : vector<1x8xf32>, vector<8x16xf32>, vector<1x16xf32> -> vector<1x16xf32>
      %c0_38 = arith.constant 0 : index
      %c0_39 = arith.constant 0 : index
      %38 = vector.load %arg11[%c0_38, %c0_39] : memref<1x16xf32, #tpu.memory_space<vmem>>, vector<1x16xf32>
      %39 = arith.addf %37, %38 : vector<1x16xf32>
      %c0_40 = arith.constant 0 : index
      %c0_41 = arith.constant 0 : index
      %40 = vector.load %arg12[%c0_40, %c0_41] : memref<1x16xf32, #tpu.memory_space<vmem>>, vector<1x16xf32>
      tpu.vector_store %arg12[%c0_40, %c0_41], %39 {strides = array<i32>} : memref<1x16xf32, #tpu.memory_space<vmem>>, vector<1x16xf32>,
    } else {
    }
    return
  }
  func.func @transform_0(%arg0: i32) -> (i32, i32, i32) {
    %c0_i32 = arith.constant 0 : i32
    %c0_i32_0 = arith.constant 0 : i32
    %c0_i32_1 = arith.constant 0 : i32
    return %arg0, %c0_i32, %c0_i32_0 : i32, i32, i32
  }
  func.func @transform_1(%arg0: i32) -> (i32, i32) {
    %c0_i32 = arith.constant 0 : i32
    %c0_i32_0 = arith.constant 0 : i32
    %c0_i32_1 = arith.constant 0 : i32
    return %c0_i32, %c0_i32_0 : i32, i32
  }
  func.func @transform_2(%arg0: i32) -> (i32, i32) {
    %c0_i32 = arith.constant 0 : i32
    %c0_i32_0 = arith.constant 0 : i32
    %c0_i32_1 = arith.constant 0 : i32
    return %c0_i32, %c0_i32_0 : i32, i32
  }
  func.func @transform_3(%arg0: i32) -> (i32, i32) {
    %c0_i32 = arith.constant 0 : i32
    %c0_i32_0 = arith.constant 0 : i32
    %c0_i32_1 = arith.constant 0 : i32
    return %c0_i32, %c0_i32_0 : i32, i32
  }
  func.func @transform_4(%arg0: i32) -> (i32, i32) {
    %c0_i32 = arith.constant 0 : i32
    %c0_i32_0 = arith.constant 0 : i32
    %c0_i32_1 = arith.constant 0 : i32
    return %c0_i32, %c0_i32_0 : i32, i32
  }
  func.func @transform_5(%arg0: i32) -> (i32, i32) {
    %c0_i32 = arith.constant 0 : i32
    %c0_i32_0 = arith.constant 0 : i32
    %c0_i32_1 = arith.constant 0 : i32
    return %c0_i32, %c0_i32_0 : i32, i32
  }
  func.func @transform_6(%arg0: i32) -> (i32, i32) {
    %c0_i32 = arith.constant 0 : i32
    %c0_i32_0 = arith.constant 0 : i32
    %c0_i32_1 = arith.constant 0 : i32
    return %c0_i32, %c0_i32_0 : i32, i32
  }
  func.func @transform_7(%arg0: i32) -> (i32, i32) {
    %c0_i32 = arith.constant 0 : i32
    %c0_i32_0 = arith.constant 0 : i32
    %c0_i32_1 = arith.constant 0 : i32
    return %c0_i32, %c0_i32_0 : i32, i32
  }
  func.func @transform_8(%arg0: i32) -> (i32, i32) {
    %c0_i32 = arith.constant 0 : i32
    %c0_i32_0 = arith.constant 0 : i32
    %c0_i32_1 = arith.constant 0 : i32
    return %c0_i32, %c0_i32_0 : i32, i32
  }
  func.func @transform_9(%arg0: i32) -> (i32, i32) {
    %c0_i32 = arith.constant 0 : i32
    %c0_i32_0 = arith.constant 0 : i32
    %c0_i32_1 = arith.constant 0 : i32
    return %c0_i32, %c0_i32_0 : i32, i32
  }
  func.func @transform_10(%arg0: i32) -> (i32, i32) {
    %c0_i32 = arith.constant 0 : i32
    %c0_i32_0 = arith.constant 0 : i32
    %c0_i32_1 = arith.constant 0 : i32
    return %c0_i32, %c0_i32_0 : i32, i32
  }
  func.func @transform_11(%arg0: i32) -> (i32, i32) {
    %c0_i32 = arith.constant 0 : i32
    %c0_i32_0 = arith.constant 0 : i32
    %c0_i32_1 = arith.constant 0 : i32
    return %c0_i32, %c0_i32_0 : i32, i32
  }
}

</mosaic_0001>

<bundles_post_ra>
// kernel: tpu_custom_call.1
= control target key start
LH: loop header
LB: loop body
LE: loop exit
PB: predicated region body
PF: predicated region fallthrough
CT: control target
= control target key end

     0   :  { %v743_v3 = vmov 0.0|0.0   ;;  %vm744_vm0 = vmmov 0   ;;  %v745_v6 = vmov 0.0   ;;  %s1005_s0 = inlined_call_operand.vmem [shape: f32[1,8,128], index: 0, kind: input, shape index: {}]   ;;  %s1006_s1 = inlined_call_operand.vmem [shape: f32[128,128], index: 1, kind: input, shape index: {}]   ;;  %s1007_s2 = inlined_call_operand.vmem [shape: f32[1,128], index: 2, kind: input, shape index: {}]   ;;  %s1008_s3 = inlined_call_operand.vmem [shape: f32[128,64], index: 3, kind: input, shape index: {}]   ;;  %s1009_s4 = inlined_call_operand.vmem [shape: f32[1,64], index: 4, kind: input, shape index: {}]   ;;  %s1010_s5 = inlined_call_operand.vmem [shape: f32[64,32], index: 5, kind: input, shape index: {}]   ;;  %s1011_s6 = inlined_call_operand.vmem [shape: f32[1,32], index: 6, kind: input, shape index: {}]   ;;  %s1012_s7 = inlined_call_operand.vmem [shape: f32[32,8], index: 7, kind: input, shape index: {}]   ;;  %s1013_s8 = inlined_call_operand.vmem [shape: f32[1,8], index: 8, kind: input, shape index: {}]   ;;  %s1014_s9 = inlined_call_operand.vmem [shape: f32[8,16], index: 9, kind: input, shape index: {}]   ;;  %s1015_s10 = inlined_call_operand.vmem [shape: f32[1,16], index: 10, kind: input, shape index: {}]   ;;  %s1016_s11 = inlined_call_operand.hbm [shape: f32[1,16], index: 11, kind: output, shape index: {}]  }
   0x1   :  { %v59_v0 = vld [vmem:[%s1006_s1] sm:$0xff]  ;;  %v60_v1 = vld [vmem:[%s1006_s1 + $0x8] sm:$0xff]  ;;  %v61_v2 = vld [vmem:[%s1006_s1 + $0x10] sm:$0xff]  ;;  %649 = vmatprep.subr.bf16.mxu0 %v743_v3  ;;  %576 = vmatprep.mubr.msk.f32.mxu0 %vm744_vm0, %v745_v6 }
   0x2   :  { %v650_v4 = vpack.c.bf16 %v60_v1, %v59_v0  ;;  %v62_v5 = vld [vmem:[%s1006_s1 + $0x18] sm:$0xff]  ;;  %673 = vmatprep.subr.bf16.mxu1 %v743_v3  ;;  %611 = vmatprep.mubr.msk.f32.mxu1 %vm744_vm0, %v745_v6  ;;  %v63_v8 = vld [vmem:[%s1006_s1 + $0x20] sm:$0xff]  ;;  %v64_v9 = vld [vmem:[%s1006_s1 + $0x28] sm:$0xff] }
   0x3   :  { %v653_v7 = vpack.c.bf16 %v62_v5, %v61_v2  ;;  %v148_v10 = vld [vmem:[%s1008_s3] sm:$0xff]  ;;  %v149_v11 = vld [vmem:[%s1008_s3 + $0x8] sm:$0xff]  ;;  %v150_v12 = vld [vmem:[%s1008_s3 + $0x10] sm:$0xff]  ;;  %v656_v14 = vpack.c.bf16 %v64_v9, %v63_v8 }
   0x4   :  { %651 = vmatpush3.bf16.msra.mxu0 %v650_v4  ;;  %v151_v13 = vld [vmem:[%s1008_s3 + $0x18] sm:$0xff]  ;;  %v45_v15 = vld [vmem:[%s1005_s0] sm:$0xff]  ;;  %v674_v16 = vpack.c.bf16 %v149_v11, %v148_v10  ;;  %v65_v17 = vld [vmem:[%s1006_s1 + $0x30] sm:$0xff] }
   0x5   :  { %652 = vmatprep.subr.bf16.mxu0 %v743_v3  ;;  %v66_v18 = vld [vmem:[%s1006_s1 + $0x38] sm:$0xff]  ;;  %v677_v19 = vpack.c.bf16 %v151_v13, %v150_v12  ;;  %v53_v20 = vrot.slane %v45_v15, 4  ;;  %v152_v21 = vld [vmem:[%s1008_s3 + $0x20] sm:$0xff]  ;;  %v153_v22 = vld [vmem:[%s1008_s3 + $0x28] sm:$0xff] }
   0x6   :  { %675 = vmatpush3.bf16.msra.mxu1 %v674_v16 }
   0x7   :  { %676 = vmatprep.subr.bf16.mxu1 %v743_v3 }
   0x8   :  { %654 = vmatpush3.bf16.msra.mxu0 %v653_v7 }
   0x9   :  { %655 = vmatprep.subr.bf16.mxu0 %v743_v3 }
   0xa   :  { %16 = vsyncpa [#allocation4], 0  ;;  %v659_v23 = vpack.c.bf16 %v66_v18, %v65_v17  ;;  %v67_v24 = vld [vmem:[%s1006_s1 + $0x40] sm:$0xff]  ;;  %v68_v25 = vld [vmem:[%s1006_s1 + $0x48] sm:$0xff]  ;;  %678 = vmatpush3.bf16.msra.mxu1 %v677_v19  ;;  %v680_v26 = vpack.c.bf16 %v153_v22, %v152_v21  ;;  %v54_v27 = vadd.f32 %v53_v20, %v45_v15  ;;  %vm245_vm1 = vcmask 523264   ;;  %s746_s30 = smov [#allocation3]  }
   0xb   :  { %679 = vmatprep.subr.bf16.mxu1 %v743_v3  ;;  %v154_v28 = vld [vmem:[%s1008_s3 + $0x30] sm:$0xff]  ;;  %v155_v29 = vld [vmem:[%s1008_s3 + $0x38] sm:$0xff]  ;;  %v662_v30 = vpack.c.bf16 %v68_v25, %v67_v24  ;;  %v156_v35 = vld [vmem:[%s1008_s3 + $0x40] sm:$0xff]  ;;  %vm325_vm2 = vcmask 261120   ;;  %vm401_vm3 = vcmask 64512   ;;  %vm475_vm4 = vcmask 122880  }
   0xc   :  { %657 = vmatpush3.bf16.msra.mxu0 %v656_v14  ;;  %v69_v31 = vld [vmem:[%s1006_s1 + $0x50] sm:$0xff]  ;;  %v70_v32 = vld [vmem:[%s1006_s1 + $0x58] sm:$0xff]  ;;  %v683_v33 = vpack.c.bf16 %v155_v29, %v154_v28  ;;  %v55_v34 = vrot.slane %v54_v27, 2  ;;  %v157_v36 = vld [vmem:[%s1008_s3 + $0x48] sm:$0xff] }
   0xd   :  { %658 = vmatprep.subr.bf16.mxu0 %v743_v3  ;;  %v665_v37 = vpack.c.bf16 %v70_v32, %v69_v31  ;;  %v71_v38 = vld [vmem:[%s1006_s1 + $0x60] sm:$0xff]  ;;  %v72_v39 = vld [vmem:[%s1006_s1 + $0x68] sm:$0xff]  ;;  %v686_v40 = vpack.c.bf16 %v157_v36, %v156_v35  ;;  %v158_v42 = vld [vmem:[%s1008_s3 + $0x50] sm:$0xff] }
   0xe   :  { %681 = vmatpush3.bf16.msra.mxu1 %v680_v26  ;;  %v56_v41 = vadd.f32 %v55_v34, %v54_v27  ;;  %v159_v43 = vld [vmem:[%s1008_s3 + $0x58] sm:$0xff]  ;;  %v668_v44 = vpack.c.bf16 %v72_v39, %v71_v38  ;;  %v73_v45 = vld [vmem:[%s1006_s1 + $0x70] sm:$0xff]  ;;  %v160_v49 = vld [vmem:[%s1008_s3 + $0x60] sm:$0xff] }
   0xf   :  { %682 = vmatprep.subr.bf16.mxu1 %v743_v3  ;;  %v74_v46 = vld [vmem:[%s1006_s1 + $0x78] sm:$0xff]  ;;  %v689_v47 = vpack.c.bf16 %v159_v43, %v158_v42  ;;  %v161_v50 = vld [vmem:[%s1008_s3 + $0x68] sm:$0xff]  ;;  %v162_v54 = vld [vmem:[%s1008_s3 + $0x70] sm:$0xff] }
  0x10   :  { %660 = vmatpush3.bf16.msra.mxu0 %v659_v23  ;;  %v57_v48 = vrot.slane %v56_v41, 1  ;;  %v671_v51 = vpack.c.bf16 %v74_v46, %v73_v45  ;;  %v692_v52 = vpack.c.bf16 %v161_v50, %v160_v49  ;;  %v163_v55 = vld [vmem:[%s1008_s3 + $0x78] sm:$0xff]  ;;  %v236_v57 = vld [vmem:[%s1010_s5] sm:$0xff]  ;;  %v237_v58 = vld [vmem:[%s1010_s5 + $0x8] sm:$0xff] }
  0x11   :  { %661 = vmatprep.subr.bf16.mxu0 %v743_v3  ;;  %v695_v56 = vpack.c.bf16 %v163_v55, %v162_v54  ;;  %v238_v59 = vld [vmem:[%s1010_s5 + $0x10] sm:$0xff]  ;;  %v698_v60 = vpack.c.bf16 %v237_v58, %v236_v57  ;;  %v239_v61 = vld [vmem:[%s1010_s5 + $0x18] sm:$0xff]  ;;  %v240_v63 = vld [vmem:[%s1010_s5 + $0x20] sm:$0xff] }
  0x12   :  { %684 = vmatpush3.bf16.msra.mxu1 %v683_v33  ;;  %v58_v53 = vadd.f32 %v57_v48, %v56_v41  ;;  %v701_v62 = vpack.c.bf16 %v239_v61, %v238_v59  ;;  %v241_v0 = vld [vmem:[%s1010_s5 + $0x28] sm:$0xff]  ;;  %v146_v4 = vld [vmem:[%s1007_s2] sm:$0x1]  ;;  %v242_v9 = vld [vmem:[%s1010_s5 + $0x30] sm:$0xff] }
  0x13   :  { %685 = vmatprep.subr.bf16.mxu1 %v743_v3  ;;  %v704_v1 = vpack.c.bf16 %v241_v0, %v240_v63  ;;  %v243_v10 = vld [vmem:[%s1010_s5 + $0x38] sm:$0xff]  ;;  %v320_v12 = vld [vmem:[%s1012_s7] sm:$0xff]  ;;  %v321_v13 = vld [vmem:[%s1012_s7 + $0x8] sm:$0xff] }
  0x14   :  { %663 = vmatpush3.bf16.msra.mxu0 %v662_v30  ;;  %v707_v11 = vpack.c.bf16 %v243_v10, %v242_v9  ;;  %v710_v14 = vpack.c.bf16 %v321_v13, %v320_v12  ;;  %v164_v15 = vld [vmem:[%s1009_s4] sm:$0x1]  ;;  %v322_v20 = vld [vmem:[%s1012_s7 + $0x10] sm:$0xff]  ;;  %v323_v21 = vld [vmem:[%s1012_s7 + $0x18] sm:$0xff] }
  0x15   :  { %664 = vmatprep.subr.bf16.mxu0 %v743_v3  ;;  %v713_v22 = vpack.c.bf16 %v323_v21, %v322_v20  ;;  %v399_v27 = vld [vmem:[%s1014_s9] sm:$0xff]  ;;  %s483_s9 = sshll.u32 %s746_s30, 4  ;;  %s484_s9 = int_to_ptr.vmem [resolvable:$true] %s483_s9 }
  0x16   :  { %687 = vmatpush3.bf16.msra.mxu1 %v686_v40  ;;  %v324_v28 = vld [vmem:[%s1013_s8] sm:$0x1]  ;;  %s719_s12 = scalar_lea.vmem %s484_s9, 16  ;;  %s723_s8 = scalar_lea.vmem %s484_s9, 32 }
  0x17   :  { %688 = vmatprep.subr.bf16.mxu1 %v743_v3  ;;  %v400_v32 = vld [vmem:[%s1015_s10] sm:$0x1]  ;;  %p720_p0 = scmp.ne.s32.totalorder %s484_s9, %s719_s12  ;;  %p724_p1 = scmp.lt.s32.totalorder %s484_s9, %s484_s9 }
  0x18   :  { %666 = vmatpush3.bf16.msra.mxu0 %v665_v37  ;;  %p725_p2 = scmp.lt.s32.totalorder %s723_s8, %s719_s12 }
  0x19   :  { %667 = vmatprep.subr.bf16.mxu0 %v743_v3 }
  0x1a   :  { %690 = vmatpush3.bf16.msra.mxu1 %v689_v47  ;;  %p726_p3 = por %p725_p2, %p724_p1 }
  0x1b   :  { %691 = vmatprep.subr.bf16.mxu1 %v743_v3 }
  0x1c   :  { %669 = vmatpush3.bf16.msra.mxu0 %v668_v44  ;;  %p727_p4 = pnand %p726_p3, %p720_p0 }
  0x1d   :  { %670 = vmatprep.subr.bf16.mxu0 %v743_v3 }
  0x1e   :  { %693 = vmatpush3.bf16.msra.mxu1 %v692_v52 }
  0x1f   :  { %694 = vmatprep.subr.bf16.mxu1 %v743_v3 }
  0x20   :  { %672 = vmatpush3.bf16.msra.mxu0 %v671_v51 }
  0x21   :  { %697 = vmatprep.subr.bf16.mxu0 %v743_v3 }
  0x22   :  { %696 = vmatpush3.bf16.msra.mxu1 %v695_v56 }
  0x23   :  { %577 = vmatmul.mubr.f32.vlgmr.msra.gmra.mrb[0].mxu0 %v58_v53  ;;  %709 = vmatprep.subr.bf16.mxu1 %v743_v3 }
  0x24   :  { %630 = vmatprep.mubr.msk.f32.mxu0 %vm744_vm0, %v745_v6  ;;  %699 = vmatpush3.bf16.msra.mxu0 %v698_v60 }
  0x25   :  { %700 = vmatprep.subr.bf16.mxu0 %v743_v3 }
  0x28   :  { %702 = vmatpush3.bf16.msra.mxu0 %v701_v62 }
  0x29   :  { %703 = vmatprep.subr.bf16.mxu0 %v743_v3 }
  0x2c   :  { %705 = vmatpush3.bf16.msra.mxu0 %v704_v1 }
  0x2d   :  { %706 = vmatprep.subr.bf16.mxu0 %v743_v3 }
  0x30   :  { %708 = vmatpush3.bf16.msra.mxu0 %v707_v11 }
  0xf6   :  { %v141_v2 = vpop.f32.mrb[0].mxu0 }
  0xf7   :  { %v145_v5 = vmul.f32 0.00390625, %v141_v2  ;;  %v578_v7 = vpop.f32.mrb[1].mxu0 }
  0xf9   :  { %v147_v8 = vadd.f32 %v146_v4, %v145_v5 }
  0xfb   :  { %612 = vmatmul.mubr.f32.vlgmr.msra.gmra.mrb[0].mxu1 %v147_v8 }
  0xfc   :  { %641 = vmatprep.mubr.msk.f32.mxu1 %vm744_vm0, %v745_v6  ;;  %711 = vmatpush3.bf16.msra.mxu1 %v710_v14 }
  0xfd   :  { %712 = vmatprep.subr.bf16.mxu1 %v743_v3  ;;  %v244_v3 = vld [vmem:[%s1011_s6] sm:$0x1] }
 0x100   :  { %714 = vmatpush3.bf16.msra.mxu1 %v713_v22 }
 0x101   :  { %644 = vmatprep.subr.mxu1 %v745_v6 }
 0x1ce   :  { %v231_v16 = vpop.f32.mrb[0].mxu1 }
 0x1cf   :  { %v232_v17 = vadd.f32 %v231_v16, %v164_v15  ;;  %v613_v18 = vpop.f32.mrb[1].mxu1 }
 0x1d1   :  { %v235_v19 = vmax.f32 %v232_v17, 0.0 }
 0x1d3   :  { %631 = vmatmul.mubr.msk.f32.vlgmr.msra.gmra.mrb[2].mxu0 %vm245_vm1, %v235_v19 }
 0x2a6   :  { %v315_v23 = vpop.f32.mrb[2].mxu0 }
 0x2a7   :  { %v316_v24 = vadd.f32 %v315_v23, %v244_v3  ;;  %v632_v25 = vpop.f32.mrb[3].mxu0 }
 0x2a9   :  { %v319_v26 = vmax.f32 %v316_v24, 0.0 }
 0x2ab   :  { %642 = vmatmul.mubr.msk.f32.vlgmr.msra.gmra.mrb[2].mxu1 %vm325_vm2, %v319_v26 }
 0x2ac   :  { %645 = vmatpush3.msra.mxu1 %v399_v27  ;;  %646 = vmatprep.mubr.msk.f32.mxu1 %vm744_vm0, %v745_v6 }
 0x37e   :  { %v395_v29 = vpop.f32.mrb[2].mxu1 }
 0x37f   :  { %v396_v30 = vadd.f32 %v395_v29, %v324_v28  ;;  %v643_v31 = vpop.f32.mrb[3].mxu1 }
 0x381   :  { %647 = vmatmul.mubr.msk.f32.vlgmr.msra.gmra.mrb[4].mxu1 %vm401_vm3, %v396_v30 }
 0x454   :  { %v471_v33 = vpop.f32.mrb[4].mxu1 }
 0x455   :  { %v472_v34 = vadd.f32 %v471_v33, %v400_v32  ;;  %v648_v35 = vpop.f32.mrb[5].mxu1 }
 0x457   :  { %476 = vst.msk [vmem:[#allocation3] sm:$0x1] %vm475_vm4, %v472_v34 }
 0x458   :  { %730 = shalt.err (!%p727_p4)
}
 0x459   :  { %s731_s10 = scalar_lea.hbm %s1016_s11, 16 }
 0x45a   :  { %p732_p5 = scmp.ne.s32.totalorder %s1016_s11, %s731_s10  ;;  %p735_p6 = scmp.lt.u32.totalorder %s731_s10, %s1016_s11 }
 0x45c   :  { %p737_p7 = pnand %p735_p6, %p732_p5 }
 0x45e   :  { %740 = shalt.err (!%p737_p7)
}
 0x45f   :  { %486 = dma.vmem_to_hbm [thread:$0]  %s484_s9, 16, %s1016_s11, [#allocation4]  }
 0x460   :  { %741 = dma.done.wait [#allocation4], 16  }
 0x461   :  { %742 = vsyncadd [#allocation4], 4294967280 }
 0x462   :  { %490 = vsyncpa [#allocation4], 1 }

</bundles_post_ra>
